<compile_context>
chip_gen: v7x
topology: tpu7x:2x2x1
jax: 0.10.0
libtpu: 0.0.40
codegen_flags: <defaults>
</compile_context>

<pallas_src>
import jax
import jax.numpy as jnp
from jax import lax
from jax.experimental import pallas as pl
from jax.experimental.pallas import tpu as pltpu


def _round_up(x, m):
    return ((x + m - 1) // m) * m


def _pick_divisor_tile(total, max_tile, unit=128):
    """Largest multiple of `unit` that divides `total` and is <= max_tile."""
    best = unit
    t = unit
    while t <= min(max_tile, total):
        if total % t == 0:
            best = t
        t += unit
    return best


def _mlp_kernel(x_ref, w_ref, b_ref, o_ref):
    # x_ref: (C, THW)   NCHW-layout activation tile (C in sublanes, HW in lanes)
    # w_ref: (C, TN)    weight tile
    # b_ref: (1, TN)    bias tile
    # o_ref: (THW, TN)  output tile (lane-dense: TN is a multiple of 128)
    acc = lax.dot_general(
        x_ref[...], w_ref[...],
        dimension_numbers=(((0,), (0,)), ((), ())),   # contract over C
        preferred_element_type=jnp.float32,
        precision=lax.Precision.HIGHEST,
    )
    o_ref[...] = (acc + b_ref[...]).astype(o_ref.dtype)


def mlp_forward(x_nchw, weight, bias, *, tile_hw=1024, tile_n=1024,
                vmem_budget_bytes=12 << 20):
    """x_nchw: (B, C, H, W); weight: (C, E); bias: (E,). Returns (B, H*W, E)."""
    B, C, H, W = x_nchw.shape
    E = weight.shape[1]
    HW = H * W
    LANE = 128
    bytes_per = jnp.dtype(x_nchw.dtype).itemsize

    # --- tile choices -------------------------------------------------------
    E_pad = _round_up(E, LANE)                                 # lane-dense out
    tn = _pick_divisor_tile(E_pad, max(tile_n, LANE), LANE)    # weight/out N tile
    thw = min(_round_up(tile_hw, LANE), _round_up(HW, LANE))   # HW (row) tile

    # Shrink the HW tile until double-buffered working set fits the budget.
    def vmem_use(t):
        x_t = C * t * bytes_per
        w_t = C * tn * bytes_per
        b_t = tn * bytes_per
        o_t = t * tn * bytes_per
        return 2 * (x_t + w_t + b_t + o_t)          # 2x for double buffering

    while thw > LANE and vmem_use(thw) > vmem_budget_bytes:
        thw -= LANE
    HW_pad = _round_up(HW, thw)

    # --- layout glue (no transpose; only zero padding where needed) ---------
    x3 = x_nchw.reshape(B, C, HW)
    if HW_pad != HW:
        x3 = jnp.pad(x3, ((0, 0), (0, 0), (0, HW_pad - HW)))
    w = weight
    b2d = bias.reshape(1, E)
    if E_pad != E:
        w = jnp.pad(w, ((0, 0), (0, E_pad - E)))
        b2d = jnp.pad(b2d, ((0, 0), (0, E_pad - E)))

    grid = (B, HW_pad // thw, E_pad // tn)   # e innermost: x tile reused across e

    out = pl.pallas_call(
        _mlp_kernel,
        out_shape=jax.ShapeDtypeStruct((B, HW_pad, E_pad), x_nchw.dtype),
        grid_spec=pltpu.PrefetchScalarGridSpec(
            num_scalar_prefetch=0,
            grid=grid,
            in_specs=[
                # x tile: (C, thw) per (batch, hw-tile); constant across e
                pl.BlockSpec((None, C, thw), lambda b, j, e: (b, 0, j)),
                # weight tile: (C, tn)
                pl.BlockSpec((C, tn), lambda b, j, e: (0, e)),
                # bias tile: (1, tn)
                pl.BlockSpec((1, tn), lambda b, j, e: (0, e)),
            ],
            out_specs=pl.BlockSpec((None, thw, tn), lambda b, j, e: (b, j, e)),
        ),
        compiler_params=pltpu.CompilerParams(
            dimension_semantics=("parallel", "parallel", "parallel")),
    )(x3, w, b2d)

    # Strip the padding (no-op slices when nothing was padded).
    return out[:, :HW, :E]


def _init_params(key, dim, embed_dim, dtype=jnp.float32):
    # Deterministic init mimicking nn.Linear defaults: U(-1/sqrt(dim), 1/sqrt(dim))
    kw, kb = jax.random.split(key)
    bound = 1.0 / (dim ** 0.5)
    # PyTorch Linear weight is (embed_dim, dim); we store its transpose (dim, embed_dim)
    weight = jax.random.uniform(kw, (dim, embed_dim), dtype, -bound, bound)
    bias = jax.random.uniform(kb, (embed_dim,), dtype, -bound, bound)
    return weight, bias


if __name__ == "__main__":
    key = jax.random.PRNGKey(0)
    kx, kp = jax.random.split(key)

    B, C, H, W = 2, 4, 16, 16      # dim = C = 4
    embed_dim = 32

    x = jax.random.normal(kx, (B, C, H, W), jnp.float32)
    weight, bias = _init_params(kp, C, embed_dim)

    out = mlp_forward(x, weight, bias)
    jax.block_until_ready(out)

    # reference check (plain JAX, matching precision)
    x_tok = jnp.transpose(x.reshape(B, C, H * W), (0, 2, 1))
    ref = jnp.einsum("bmc,ce->bme", x_tok, weight,
                     precision=lax.Precision.HIGHEST) + bias
    assert out.shape == (B, H * W, embed_dim)
    assert jnp.allclose(out, ref, atol=1e-5, rtol=1e-5)

    print("KERNEL_OK")
</pallas_src>

<mosaic_0001>
module attributes {stable_mosaic.version = 11 : i64} {
  func.func @_mlp_kernel(%arg0: i32, %arg1: i32, %arg2: i32, %arg3: memref<1x4x256xf32, #tpu.memory_space<vmem>>, %arg4: memref<4x128xf32, #tpu.memory_space<vmem>>, %arg5: memref<1x128xf32, #tpu.memory_space<vmem>>, %arg6: memref<1x256x128xf32, #tpu.memory_space<vmem>>) attributes {dimension_semantics = [#tpu.dimension_semantics<parallel>, #tpu.dimension_semantics<parallel>, #tpu.dimension_semantics<parallel>], iteration_bounds = array<i64: 2, 1, 1>, scalar_prefetch = 0 : i64, scratch_operands = 0 : i64, tpu.core_type = #tpu.core_type<tc>, window_params = [{transform_indices = @transform_0, window_bounds = array<i64: 1, 4, 256>}, {transform_indices = @transform_1, window_bounds = array<i64: 4, 128>}, {transform_indices = @transform_2, window_bounds = array<i64: 1, 128>}, {transform_indices = @transform_3, window_bounds = array<i64: 1, 256, 128>}]} {
    %c0 = arith.constant 0 : index
    %c0_0 = arith.constant 0 : index
    %c0_1 = arith.constant 0 : index
    %0 = vector.load %arg3[%c0, %c0_0, %c0_1] : memref<1x4x256xf32, #tpu.memory_space<vmem>>, vector<1x4x256xf32>
    %1 = vector.shape_cast %0 : vector<1x4x256xf32> to vector<4x256xf32>
    %c0_2 = arith.constant 0 : index
    %c0_3 = arith.constant 0 : index
    %2 = vector.load %arg4[%c0_2, %c0_3] : memref<4x128xf32, #tpu.memory_space<vmem>>, vector<4x128xf32>
    %cst = arith.constant dense<0.000000e+00> : vector<256x128xf32>
    %3 = tpu.matmul %1, %2, %cst {dimension_numbers = #tpu.dot_dimension_numbers<[0], [0], [1], [1], [0, 1, 1, 1], [], []>, precision = #tpu.contract_precision<fp32>} : vector<4x256xf32>, vector<4x128xf32>, vector<256x128xf32> -> vector<256x128xf32>
    %c0_4 = arith.constant 0 : index
    %c0_5 = arith.constant 0 : index
    %4 = vector.load %arg5[%c0_4, %c0_5] : memref<1x128xf32, #tpu.memory_space<vmem>>, vector<1x128xf32>
    %5 = vector.broadcast %4 : vector<1x128xf32> to vector<256x128xf32>
    %6 = arith.addf %3, %5 : vector<256x128xf32>
    %c0_6 = arith.constant 0 : index
    %c0_7 = arith.constant 0 : index
    %c0_8 = arith.constant 0 : index
    %7 = vector.load %arg6[%c0_6, %c0_7, %c0_8] : memref<1x256x128xf32, #tpu.memory_space<vmem>>, vector<1x256x128xf32>
    %8 = vector.shape_cast %7 : vector<1x256x128xf32> to vector<256x128xf32>
    %9 = vector.shape_cast %6 : vector<256x128xf32> to vector<1x256x128xf32>
    tpu.vector_store %arg6[%c0_6, %c0_7, %c0_8], %9 {strides = array<i32>} : memref<1x256x128xf32, #tpu.memory_space<vmem>>, vector<1x256x128xf32>,
    return
  }
  func.func @transform_0(%arg0: i32, %arg1: i32, %arg2: i32) -> (i32, i32, i32) {
    %c0_i32 = arith.constant 0 : i32
    %c0_i32_0 = arith.constant 0 : i32
    return %arg0, %c0_i32, %arg1 : i32, i32, i32
  }
  func.func @transform_1(%arg0: i32, %arg1: i32, %arg2: i32) -> (i32, i32) {
    %c0_i32 = arith.constant 0 : i32
    %c0_i32_0 = arith.constant 0 : i32
    return %c0_i32, %arg2 : i32, i32
  }
  func.func @transform_2(%arg0: i32, %arg1: i32, %arg2: i32) -> (i32, i32) {
    %c0_i32 = arith.constant 0 : i32
    %c0_i32_0 = arith.constant 0 : i32
    return %c0_i32, %arg2 : i32, i32
  }
  func.func @transform_3(%arg0: i32, %arg1: i32, %arg2: i32) -> (i32, i32, i32) {
    %c0_i32 = arith.constant 0 : i32
    return %arg0, %arg1, %arg2 : i32, i32, i32
  }
}

</mosaic_0001>

<bundles_post_ra>
// kernel: tpu_custom_call.1
= control target key start
LH: loop header
LB: loop body
LE: loop exit
PB: predicated region body
PF: predicated region fallthrough
CT: control target
= control target key end

     0   :  { %8 = vsyncpa [#allocation3], 0  ;;  %s4019_s0 = inlined_call_operand.hbm [shape: f32[2,4,256], index: 0, kind: input, shape index: {}]   ;;  %s4020_s1 = inlined_call_operand.hbm [shape: f32[4,128], index: 1, kind: input, shape index: {}]   ;;  %s4021_s2 = inlined_call_operand.vmem [shape: f32[1,128], index: 2, kind: input, shape index: {}]   ;;  %s4022_s3 = inlined_call_operand.hbm [shape: f32[2,256,128], index: 3, kind: output, shape index: {}]  }
   0x1   :  { %10 = vsyncpa [#allocation3 + $0x1], 0 }
   0x2   :  { %11 = vsyncpa [#allocation6], 0 }
   0x3   :  { %12 = vsyncpa [#allocation4], 0 }
   0x4   :  { %14 = vsyncpa [#allocation4 + $0x1], 0  ;;  %s3329_s12 = smov 0   ;;  %s3331_s13 = smov 0  }
   0x5   :  { %s3333_s14 = smov 0   ;;  %s3335_s15 = smov 0  }
   0x6   :  { %s3337_s16 = smov 0   ;;  %s3339_s17 = smov 0  }
   0x7 LB: > { %s2370_s18 = sadd.s32 4294967295, %s3302_s17   ;;  %s2371_s19 = sadd.s32 4294967294, %s3302_s17   ;;  %s3302_s17 = sphi %s3339_s17, %s20_s17   ;;  %s3298_s16 = sphi %s3337_s16, %s4080_s16   ;;  %s3294_s15 = sphi %s3335_s15, %s4079_s15   ;;  %s3290_s14 = sphi %s3333_s14, %s4078_s14   ;;  %s3286_s13 = sphi %s3331_s13, %s4077_s13   ;;  %s3282_s12 = sphi %s3329_s12, %s4076_s12  }
   0x8   : > { %p61_p0 = scmp.ne.s32.totalorder %s3286_s13, %s3282_s12  ;;  %p3363_p1 = scmp.eq.s32.totalorder %s2370_s18, 0 }
   0x9   : > { %p3367_p2 = scmp.eq.s32.totalorder %s2370_s18, 1  ;;  %p147_p3 = scmp.eq.s32.totalorder %s2371_s19, 1 }
   0xa   : > { %s4038_s20 = scalar_select %p3363_p1, 1, 0 }
   0xb   : > { %s4039_s21 = scalar_select %p3367_p2, 1, 0 }
   0xc   : > { %p3373_p4 = por %p3363_p1, %p61_p0  ;;  %p2372_p5 = scmp.ge.s32.totalorder %s3302_s17, 1 }
   0xd   : > { %p3378_p6 = por %p147_p3, %p61_p0  ;;  %p154_p7 = scmp.lt.s32.totalorder %s3302_s17, 3 }
   0xe   : > { %s4040_s22 = scalar_select %p3373_p4, 1, 0 }
   0xf   : > { %s4041_s23 = scalar_select %p3378_p6, 1, 0 }
  0x10   : > { %p3383_p8 = pnand %p2372_p5, %p154_p7  ;;  %s3304_s25 = smov [#allocation5]  }
  0x11   : > { %s169_s26 = sshll.u32 %s3304_s25, 4  ;;  %s39_s28 = sadd.s32 1, %s3298_s16  ;;  %s170_s26 = int_to_ptr.vmem [resolvable:$true] %s169_s26 }
  0x12   : > { %s4042_s24 = scalar_select %p3383_p8, 1, 0 }
  0x13   : > { %p3089_p10 = pneg %p3383_p8  ;;  %s48_s29 = sadd.s32 1, %s3290_s14 }
  0x14   : > { %p3398_p12 = scmp.ge.s32.totalorder %s39_s28, 2  ;;  %s3158_s6 = scalar_lea.hbm %s4020_s1, 64 }
  0x15   : > { %p3392_p11 = pnand %p3089_p10, %p3363_p1  ;;  %p3159_p13 = scmp.ne.s32.totalorder %s4020_s1, %s3158_s6 }
  0x16   : > { %s4044_s30 = scalar_select %p3398_p12, 1, 0 }
  0x17   : > { %p3160_p0 = pneg %p3392_p11  ;;  %p3165_p7 = scmp.lt.u32.totalorder %s3158_s6, %s4020_s1 }
  0x19   : > { %p3161_p3 = pnand %p3160_p0, %p3159_p13 }
  0x1b   : > { %p3162_p5 = pneg %p3161_p3 }
  0x1d   : > { %p3167_p10 = pnand %p3165_p7, %p3162_p5 }
  0x1f   : > { %3170 = shalt.err (!%p3167_p10)
}
  0x20   : > { %s3171_s11 = scalar_lea.vmem %s170_s26, 64  ;;  %p3179_p4 = scmp.lt.s32.totalorder %s170_s26, %s170_s26 }
  0x21   : > { %p3172_p9 = scmp.ne.s32.totalorder %s170_s26, %s3171_s11  ;;  %p3180_p8 = scmp.lt.s32.totalorder %s3171_s11, %s3171_s11 }
  0x23   : > { %p3174_p6 = pnand %p3172_p9, %p3160_p0  ;;  %p3181_p2 = por %p3180_p8, %p3179_p4 }
  0x25   : > { %p3175_p1 = pneg %p3174_p6 }
  0x27   : > { %p3182_p12 = pnand %p3181_p2, %p3175_p1 }
  0x29   : > { %3185 = shalt.err (!%p3182_p12)
}
  0x2a   : > { %3092 = dma.hbm_to_vmem [thread:$0]  (!%p3392_p11), %s4020_s1, 64, %s170_s26, [#allocation6]  }
  0x2b   : > { %p4045_p4 = scmp.ne.s32.totalorder %s4044_s30, 0  ;;  %p55_p1 = scmp.ne.s32.totalorder %s3290_s14, %s3286_s13 }
  0x2c   : > { %p56_p2 = scmp.eq.s32.totalorder %s3302_s17, 0  ;;  %p3102_p6 = scmp.lt.s32.totalorder %s3302_s17, 2 }
  0x2d   : > { %s4082_s28 = smov (%p4045_p4, %s39_s28), 0  ;;  %p4046_p12 = scmp.ne.s32.totalorder %s4039_s21, 0 }
  0x2e   : > { %s43_s25 = ssub.s32 %s3298_s16, %s4082_s28  ;;  %p57_p9 = por %p56_p2, %p55_p1 }
  0x2f   : > { %p46_p8 = scmp.eq.s32.totalorder %s43_s25, 0  ;;  %p3430_p13 = por %p4046_p12, %p55_p1 }
  0x30   : > { %s186_s4 = sand.u32 1, %s3290_s14   ;;  %s2389_s30 = sshll.u32 %s3298_s16, 7 }
  0x31   : > { %s3438_s5 = scalar_select %p46_p8, %s3290_s14, %s48_s29  }
  0x32   : > { %s2376_s26 = sshll.u32 %s186_s4, 3  ;;  %s3444_s8 = scalar_lea.hbm %s4019_s0, %s2389_s30 }
  0x33   : > { %s190_s21 = scalar_lea.vmem [#allocation2], %s2376_s26  ;;  %p3448_p11 = pnand %p3102_p6, %p57_p9 }
  0x34   : > { %s200_s9 = sshll.u32 %s190_s21, 4  ;;  %s187_s29 = scalar_lea.sflag [#allocation3], %s186_s4  ;;  %s3446_s9 = int_to_ptr.vmem [resolvable:$true] %s200_s9 }
  0x35   : > { %s3186_s11 = scalar_lea.hbm %s3444_s8, 128  ;;  %p3188_p3 = pneg %p3448_p11 }
  0x36   : > { %p3187_p0 = scmp.ne.s32.totalorder %s3444_s8, %s3186_s11  ;;  %s3191_s25 = scalar_lea.hbm %s4019_s0, 256 }
  0x37   : > { %p3192_p10 = scmp.lt.u32.totalorder %s3444_s8, %s4019_s0  ;;  %p3193_p4 = scmp.lt.u32.totalorder %s3191_s25, %s3186_s11 }
  0x38   : > { %p3189_p5 = pnand %p3188_p3, %p3187_p0  ;;  %p3195_p2 = scmp.lt.u32.totalorder %s3186_s11, %s3444_s8 }
  0x39   : > { %p3194_p1 = por %p3193_p4, %p3192_p10 }
  0x3a   : > { %p3190_p7 = pneg %p3189_p5 }
  0x3b   : > { %p3196_p6 = por %p3195_p2, %p3194_p1 }
  0x3d   : > { %p3197_p8 = pnand %p3196_p6, %p3190_p7 }
  0x3f   : > { %3200 = shalt.err (!%p3197_p8)
}
  0x40   : > { %s3201_s4 = scalar_lea.vmem %s3446_s9, 128  ;;  %s3305_s6 = smov [#allocation2]  }
  0x41   : > { %p3202_p9 = scmp.ne.s32.totalorder %s3446_s9, %s3201_s4  ;;  %s3206_s7 = sshll.u32 %s3305_s6, 4  ;;  %s3207_s7 = int_to_ptr.vmem [resolvable:$false] %s3206_s7 }
  0x42   : > { %s3208_s21 = scalar_lea.vmem %s3207_s7, 256  ;;  %p3209_p5 = scmp.lt.s32.totalorder %s3446_s9, %s3207_s7 }
  0x43   : > { %p3204_p12 = pnand %p3202_p9, %p3188_p3  ;;  %p3210_p10 = scmp.lt.s32.totalorder %s3208_s21, %s3201_s4 }
  0x45   : > { %p3205_p0 = pneg %p3204_p12  ;;  %p3211_p4 = por %p3210_p10, %p3209_p5 }
  0x47   : > { %p3212_p1 = pnand %p3211_p4, %p3205_p0 }
  0x49   : > { %3215 = shalt.err (!%p3212_p1)
}
  0x4a   : > { %3096 = dma.hbm_to_vmem [thread:$0]  (!%p3448_p11), %s3444_s8, 128, %s3446_s9, %s187_s29  }
  0x4b   : > { %p4049_p7 = scmp.ne.s32.totalorder %s4042_s24, 0 }
  0x4d   : > { %209 = sbr.rel (%p4049_p7) target bundleno = 716 (0x2cc), region = 32 }
  0x54   : > { %s3480_s11 = sand.u32 1, %s3286_s13   ;;  %p4050_p3 = scmp.ne.s32.totalorder %s4040_s22, 0 }
  0x55   : > { %s2380_s18 = sshll.u32 %s3480_s11, 3  ;;  %s212_s19 = scalar_lea.sflag [#allocation3], %s3480_s11 }
  0x56   : > { %s215_s25 = scalar_lea.vmem [#allocation2], %s2380_s18 }
  0x57   : > { %3269 = dma.done.wait (%p4050_p3), %s212_s19, 128  }
  0x58   : > { %3271 = vsyncadd (%p4050_p3), %s212_s19, 4294967168  ;;  %p4051_p2 = scmp.ne.s32.totalorder %s4038_s20, 0 }
  0x5a   : > { %3273 = dma.done.wait (%p4051_p2), [#allocation6], 64  }
  0x5b   : > { %3275 = vsyncadd (%p4051_p2), [#allocation6], 4294967232  ;;  %v250_v0 = vld [vmem:[%s215_s25] sm:$0xff]  ;;  %v251_v1 = vld [vmem:[#allocation5] sm:$0xf]  ;;  %vm423_vm0 = vcmask 1043456  }
  0x5c   : > { %262 = vxpose.xlu0.b32.start.end [1/1] (short) %v250_v0, 128  ;;  %v425_v2 = vsel %vm423_vm0, %v251_v1, 0  ;;  %v260_v4 = vcombine.high %v250_v0, %v250_v0  ;;  %vm326_vm1 = vcmask 31744   ;;  %s2382_s24 = sshll.u32 %s3480_s11, 8  ;;  %s2390_s9 = sshll.u32 %s3294_s15, 12 }
  0x5d   : > { %v3492_v3 = vand.u32 4294901760, %v425_v2  ;;  %s3899_s8 = scalar_lea.vmem [#allocation7], %s2382_s24  ;;  %s3966_s30 = scalar_lea.hbm %s4022_s3, %s2390_s9 }
  0x5e   : > { %s2255_s10 = sshll.u32 %s3899_s8, 4  ;;  %s2239_s15 = scalar_lea.sflag [#allocation4], %s3480_s11  ;;  %s3968_s10 = int_to_ptr.vmem [resolvable:$true] %s2255_s10 }
  0x5f   : > { %2739 = vmatprep.subr.mxu0 %v3492_v3  ;;  %2589 = vmatprep.subr.mxu1 %v3492_v3  ;;  %v3499_v5 = vsub.f32 %v425_v2, %v3492_v3  ;;  %s3216_s4 = scalar_lea.vmem %s3968_s10, 4096  ;;  %s3306_s6 = smov [#allocation7]  }
  0x60   : > { %2740 = vmatpush3.msra.mxu0 %v3492_v3  ;;  %2590 = vmatpush3.msra.mxu1 %v3492_v3  ;;  %p3217_p11 = scmp.ne.s32.totalorder %s3968_s10, %s3216_s4  ;;  %s3220_s7 = sshll.u32 %s3306_s6, 4  ;;  %s3221_s7 = int_to_ptr.vmem [resolvable:$false] %s3220_s7 }
  0x61   : > { %v816_v6 = vand.u32 4294901760, %v3499_v5  ;;  %s3222_s21 = scalar_lea.vmem %s3221_s7, 8192  ;;  %p3223_p9 = scmp.lt.s32.totalorder %s3968_s10, %s3221_s7 }
  0x62   : > { %p3218_p6 = pnand %p3217_p11, %p3430_p13  ;;  %p3224_p12 = scmp.lt.s32.totalorder %s3222_s21, %s3216_s4 }
  0x63   : > { %v817_v7 = vsub.f32 %v3499_v5, %v816_v6  ;;  %2789 = vmatprep.subr.mxu0 %v816_v6 }
  0x64   : > { %p3219_p8 = pneg %p3218_p6  ;;  %p3225_p0 = por %p3224_p12, %p3223_p9 }
  0x65   : > { %v818_v8 = vand.u32 4294901760, %v817_v7 }
  0x66   : > { %p3226_p5 = pnand %p3225_p0, %p3219_p8 }
  0x67   : > { %2639 = vmatprep.subr.mxu1 %v818_v8 }
  0x99   : > { %294 = vxpose.xlu0.b32.start.end [1/1] (short) %v260_v4, 128 }
  0xdc   : > { %v278_v9 = vpop.trf.xlu0 }
  0xdd   : > { %v328_v10 = vsel %vm326_vm1, %v278_v9, 0 }
  0xde   : > { %v3504_v11 = vand.u32 4294901760, %v328_v10 }
  0xe0   : > { %v3507_v12 = vsub.f32 %v328_v10, %v3504_v11  ;;  %v279_v13 = vpop.trf.xlu0 }
  0xe1   : > { %v331_v14 = vsel %vm326_vm1, %v279_v13, 0 }
  0xe2   : > { %v3510_v15 = vand.u32 4294901760, %v331_v14  ;;  %v495_v16 = vand.u32 4294901760, %v3507_v12 }
  0xe4   : > { %v3514_v17 = vsub.f32 %v331_v14, %v3510_v15  ;;  %2741 = vmatprep.mubr.f32.mxu0 %v495_v16  ;;  %v280_v18 = vpop.trf.xlu0  ;;  %v496_v19 = vsub.f32 %v3507_v12, %v495_v16 }
  0xe5   : > { %v334_v20 = vsel %vm326_vm1, %v280_v18, 0 }
  0xe6   : > { %v3518_v21 = vand.u32 4294901760, %v334_v20  ;;  %v497_v22 = vand.u32 4294901760, %v496_v19  ;;  %v505_v23 = vand.u32 4294901760, %v3514_v17 }
  0xe8   : > { %v3522_v24 = vsub.f32 %v334_v20, %v3518_v21  ;;  %2591 = vmatprep.mubr.f32.mxu1 %v497_v22  ;;  %2742 = vmatmul.mubr.f32.vlgmr.msra.gmra.mrb[0].mxu0 %v505_v23  ;;  %v281_v25 = vpop.trf.xlu0  ;;  %v506_v26 = vsub.f32 %v3514_v17, %v505_v23 }
  0xe9   : > { %v337_v27 = vsel %vm326_vm1, %v281_v25, 0  ;;  %2790 = vmatpush3.msra.mxu0 %v816_v6 }
  0xea   : > { %v3526_v28 = vand.u32 4294901760, %v337_v27  ;;  %v507_v29 = vand.u32 4294901760, %v506_v26  ;;  %v515_v30 = vand.u32 4294901760, %v3522_v24  ;;  %2839 = vmatprep.subr.mxu0 %v3492_v3 }
  0xec   : > { %v3531_v31 = vsub.f32 %v337_v27, %v3526_v28  ;;  %2592 = vmatmul.mubr.f32.vlgmr.msra.gmra.mrb[0].mxu1 %v507_v29  ;;  %2744 = vmatprep.mubr.f32.mxu0 %v515_v30  ;;  %v282_v32 = vpop.trf.xlu0  ;;  %v516_v33 = vsub.f32 %v3522_v24, %v515_v30 }
  0xed   : > { %v340_v34 = vsel %vm326_vm1, %v282_v32, 0  ;;  %2640 = vmatpush3.msra.mxu1 %v818_v8 }
  0xee   : > { %v3535_v35 = vand.u32 4294901760, %v340_v34  ;;  %v517_v36 = vand.u32 4294901760, %v516_v33  ;;  %v525_v37 = vand.u32 4294901760, %v3531_v31  ;;  %2689 = vmatprep.subr.mxu1 %v3499_v5 }
  0xf0   : > { %v3540_v38 = vsub.f32 %v340_v34, %v3535_v35  ;;  %2594 = vmatprep.mubr.f32.mxu1 %v517_v36  ;;  %2745 = vmatmul.mubr.f32.gmra.mrb[2].mxu0 %v525_v37  ;;  %v283_v39 = vpop.trf.xlu0  ;;  %v526_v40 = vsub.f32 %v3531_v31, %v525_v37 }
  0xf1   : > { %v343_v41 = vsel %vm326_vm1, %v283_v39, 0 }
  0xf2   : > { %v3544_v42 = vand.u32 4294901760, %v343_v41  ;;  %v527_v43 = vand.u32 4294901760, %v526_v40  ;;  %v535_v44 = vand.u32 4294901760, %v3540_v38 }
  0xf4   : > { %v3548_v45 = vsub.f32 %v343_v41, %v3544_v42  ;;  %2595 = vmatmul.mubr.f32.gmra.mrb[2].mxu1 %v527_v43  ;;  %2747 = vmatprep.mubr.f32.mxu0 %v535_v44  ;;  %v284_v46 = vpop.trf.xlu0  ;;  %v536_v47 = vsub.f32 %v3540_v38, %v535_v44 }
  0xf5   : > { %v346_v48 = vsel %vm326_vm1, %v284_v46, 0 }
  0xf6   : > { %v3552_v49 = vand.u32 4294901760, %v346_v48  ;;  %v537_v50 = vand.u32 4294901760, %v536_v47  ;;  %v545_v51 = vand.u32 4294901760, %v3548_v45 }
  0xf8   : > { %v3556_v52 = vsub.f32 %v346_v48, %v3552_v49  ;;  %2597 = vmatprep.mubr.f32.mxu1 %v537_v50  ;;  %2748 = vmatmul.mubr.f32.gmra.mrb[4].mxu0 %v545_v51  ;;  %v285_v53 = vpop.trf.xlu0  ;;  %v546_v54 = vsub.f32 %v3548_v45, %v545_v51 }
  0xf9   : > { %v349_v55 = vsel %vm326_vm1, %v285_v53, 0 }
  0xfa   : > { %v3560_v56 = vand.u32 4294901760, %v349_v55  ;;  %v547_v57 = vand.u32 4294901760, %v546_v54  ;;  %v555_v58 = vand.u32 4294901760, %v3556_v52 }
  0xfc   : > { %v3564_v59 = vsub.f32 %v349_v55, %v3560_v56  ;;  %2598 = vmatmul.mubr.f32.gmra.mrb[4].mxu1 %v547_v57  ;;  %2750 = vmatprep.mubr.f32.mxu0 %v555_v58  ;;  %v286_v60 = vpop.trf.xlu0  ;;  %v556_v61 = vsub.f32 %v3556_v52, %v555_v58 }
  0xfd   : > { %v352_v62 = vsel %vm326_vm1, %v286_v60, 0 }
  0xfe   : > { %v3568_v63 = vand.u32 4294901760, %v352_v62  ;;  %v557_v0 = vand.u32 4294901760, %v556_v61  ;;  %v565_v1 = vand.u32 4294901760, %v3564_v59 }
 0x100   : > { %v3572_v2 = vsub.f32 %v352_v62, %v3568_v63  ;;  %2600 = vmatprep.mubr.f32.mxu1 %v557_v0  ;;  %2751 = vmatmul.mubr.f32.gmra.mrb[6].mxu0 %v565_v1  ;;  %v287_v4 = vpop.trf.xlu0  ;;  %v566_v6 = vsub.f32 %v3564_v59, %v565_v1 }
 0x101   : > { %v355_v7 = vsel %vm326_vm1, %v287_v4, 0 }
 0x102   : > { %v3576_v8 = vand.u32 4294901760, %v355_v7  ;;  %v567_v9 = vand.u32 4294901760, %v566_v6  ;;  %v575_v10 = vand.u32 4294901760, %v3572_v2 }
 0x104   : > { %v3580_v13 = vsub.f32 %v355_v7, %v3576_v8  ;;  %2601 = vmatmul.mubr.f32.gmra.mrb[6].mxu1 %v567_v9  ;;  %2753 = vmatprep.mubr.f32.mxu0 %v575_v10  ;;  %v288_v14 = vpop.trf.xlu0  ;;  %v576_v16 = vsub.f32 %v3572_v2, %v575_v10 }
 0x105   : > { %v358_v18 = vsel %vm326_vm1, %v288_v14, 0 }
 0x106   : > { %v3584_v19 = vand.u32 4294901760, %v358_v18  ;;  %v577_v20 = vand.u32 4294901760, %v576_v16  ;;  %v585_v22 = vand.u32 4294901760, %v3580_v13 }
 0x108   : > { %v3588_v23 = vsub.f32 %v358_v18, %v3584_v19  ;;  %2603 = vmatprep.mubr.f32.mxu1 %v577_v20  ;;  %2754 = vmatmul.mubr.f32.gmra.mrb[8].mxu0 %v585_v22  ;;  %v289_v25 = vpop.trf.xlu0  ;;  %v586_v26 = vsub.f32 %v3580_v13, %v585_v22 }
 0x109   : > { %v361_v27 = vsel %vm326_vm1, %v289_v25, 0 }
 0x10a   : > { %v3592_v29 = vand.u32 4294901760, %v361_v27  ;;  %v587_v30 = vand.u32 4294901760, %v586_v26  ;;  %v595_v32 = vand.u32 4294901760, %v3588_v23 }
 0x10c   : > { %v3596_v33 = vsub.f32 %v361_v27, %v3592_v29  ;;  %2604 = vmatmul.mubr.f32.gmra.mrb[8].mxu1 %v587_v30  ;;  %2756 = vmatprep.mubr.f32.mxu0 %v595_v32  ;;  %v290_v34 = vpop.trf.xlu0  ;;  %v596_v36 = vsub.f32 %v3588_v23, %v595_v32 }
 0x10d   : > { %v364_v37 = vsel %vm326_vm1, %v290_v34, 0 }
 0x10e   : > { %v3600_v39 = vand.u32 4294901760, %v364_v37  ;;  %v597_v40 = vand.u32 4294901760, %v596_v36  ;;  %v605_v41 = vand.u32 4294901760, %v3596_v33 }
 0x110   : > { %v3604_v43 = vsub.f32 %v364_v37, %v3600_v39  ;;  %2606 = vmatprep.mubr.f32.mxu1 %v597_v40  ;;  %2757 = vmatmul.mubr.f32.gmra.mrb[10].mxu0 %v605_v41  ;;  %v291_v44 = vpop.trf.xlu0  ;;  %v606_v46 = vsub.f32 %v3596_v33, %v605_v41 }
 0x111   : > { %v367_v47 = vsel %vm326_vm1, %v291_v44, 0 }
 0x112   : > { %v3608_v48 = vand.u32 4294901760, %v367_v47  ;;  %v607_v50 = vand.u32 4294901760, %v606_v46  ;;  %v615_v51 = vand.u32 4294901760, %v3604_v43 }
 0x114   : > { %v3612_v53 = vsub.f32 %v367_v47, %v3608_v48  ;;  %2607 = vmatmul.mubr.f32.gmra.mrb[10].mxu1 %v607_v50  ;;  %2759 = vmatprep.mubr.f32.mxu0 %v615_v51  ;;  %v292_v54 = vpop.trf.xlu0  ;;  %v616_v55 = vsub.f32 %v3604_v43, %v615_v51 }
 0x115   : > { %v370_v57 = vsel %vm326_vm1, %v292_v54, 0 }
 0x116   : > { %v3616_v58 = vand.u32 4294901760, %v370_v57  ;;  %v617_v60 = vand.u32 4294901760, %v616_v55  ;;  %v625_v61 = vand.u32 4294901760, %v3612_v53 }
 0x118   : > { %v3620_v62 = vsub.f32 %v370_v57, %v3616_v58  ;;  %2609 = vmatprep.mubr.f32.mxu1 %v617_v60  ;;  %2760 = vmatmul.mubr.f32.gmra.mrb[12].mxu0 %v625_v61  ;;  %v293_v0 = vpop.trf.xlu0  ;;  %v626_v1 = vsub.f32 %v3612_v53, %v625_v61 }
 0x119   : > { %v373_v4 = vsel %vm326_vm1, %v293_v0, 0 }
 0x11a   : > { %v3624_v6 = vand.u32 4294901760, %v373_v4  ;;  %v627_v7 = vand.u32 4294901760, %v626_v1  ;;  %v635_v9 = vand.u32 4294901760, %v3620_v62 }
 0x11c   : > { %v3628_v10 = vsub.f32 %v373_v4, %v3624_v6  ;;  %2610 = vmatmul.mubr.f32.gmra.mrb[12].mxu1 %v627_v7  ;;  %2762 = vmatprep.mubr.f32.mxu0 %v635_v9  ;;  %v310_v14 = vpop.trf.xlu0  ;;  %v636_v16 = vsub.f32 %v3620_v62, %v635_v9 }
 0x11d   : > { %v376_v18 = vsel %vm326_vm1, %v310_v14, 0 }
 0x11e   : > { %v3632_v20 = vand.u32 4294901760, %v376_v18  ;;  %v637_v22 = vand.u32 4294901760, %v636_v16  ;;  %v645_v25 = vand.u32 4294901760, %v3628_v10 }
 0x120   : > { %v3636_v26 = vsub.f32 %v376_v18, %v3632_v20  ;;  %2612 = vmatprep.mubr.f32.mxu1 %v637_v22  ;;  %2763 = vmatmul.mubr.f32.gmra.mrb[14].mxu0 %v645_v25  ;;  %v311_v27 = vpop.trf.xlu0  ;;  %v646_v30 = vsub.f32 %v3628_v10, %v645_v25 }
 0x121   : > { %v379_v32 = vsel %vm326_vm1, %v311_v27, 0 }
 0x122   : > { %v3640_v34 = vand.u32 4294901760, %v379_v32  ;;  %v647_v36 = vand.u32 4294901760, %v646_v30  ;;  %v655_v37 = vand.u32 4294901760, %v3636_v26 }
 0x124   : > { %v3644_v40 = vsub.f32 %v379_v32, %v3640_v34  ;;  %2613 = vmatmul.mubr.f32.gmra.mrb[14].mxu1 %v647_v36  ;;  %2765 = vmatprep.mubr.f32.mxu0 %v655_v37  ;;  %v312_v41 = vpop.trf.xlu0  ;;  %v656_v44 = vsub.f32 %v3636_v26, %v655_v37 }
 0x125   : > { %v382_v46 = vsel %vm326_vm1, %v312_v41, 0 }
 0x126   : > { %v3648_v47 = vand.u32 4294901760, %v382_v46  ;;  %v657_v50 = vand.u32 4294901760, %v656_v44  ;;  %v665_v51 = vand.u32 4294901760, %v3644_v40 }
 0x128   : > { %v3652_v54 = vsub.f32 %v382_v46, %v3648_v47  ;;  %2615 = vmatprep.mubr.f32.mxu1 %v657_v50  ;;  %2766 = vmatmul.mubr.f32.gmra.mrb[16].mxu0 %v665_v51  ;;  %v313_v55 = vpop.trf.xlu0  ;;  %v666_v57 = vsub.f32 %v3644_v40, %v665_v51 }
 0x129   : > { %v385_v60 = vsel %vm326_vm1, %v313_v55, 0 }
 0x12a   : > { %4052 = vst [vmem:[#allocation11_spill] sm:$0xff] %v3652_v54  ;;  %v3656_v61 = vand.u32 4294901760, %v385_v60  ;;  %v667_v0 = vand.u32 4294901760, %v666_v57  ;;  %v675_v1 = vand.u32 4294901760, %v3652_v54 }
 0x12c   : > { %v3660_v4 = vsub.f32 %v385_v60, %v3656_v61  ;;  %2616 = vmatmul.mubr.f32.gmra.mrb[16].mxu1 %v667_v0  ;;  %2768 = vmatprep.mubr.f32.mxu0 %v675_v1  ;;  %v314_v7 = vpop.trf.xlu0  ;;  %v676_v9 = vsub.f32 %v3652_v54, %v675_v1 }
 0x12d   : > { %v388_v14 = vsel %vm326_vm1, %v314_v7, 0 }
 0x12e   : > { %4053 = vst [vmem:[#allocation12_spill] sm:$0xff] %v3660_v4  ;;  %v3664_v16 = vand.u32 4294901760, %v388_v14  ;;  %v677_v18 = vand.u32 4294901760, %v676_v9  ;;  %v685_v22 = vand.u32 4294901760, %v3660_v4 }
 0x130   : > { %v3668_v25 = vsub.f32 %v388_v14, %v3664_v16  ;;  %2618 = vmatprep.mubr.f32.mxu1 %v677_v18  ;;  %2769 = vmatmul.mubr.f32.gmra.mrb[18].mxu0 %v685_v22  ;;  %v315_v27 = vpop.trf.xlu0  ;;  %v686_v30 = vsub.f32 %v3660_v4, %v685_v22 }
 0x131   : > { %v391_v32 = vsel %vm326_vm1, %v315_v27, 0 }
 0x132   : > { %4054 = vst [vmem:[#allocation13_spill] sm:$0xff] %v3668_v25  ;;  %v3672_v36 = vand.u32 4294901760, %v391_v32  ;;  %v687_v37 = vand.u32 4294901760, %v686_v30  ;;  %v695_v41 = vand.u32 4294901760, %v3668_v25 }
 0x134   : > { %v3676_v44 = vsub.f32 %v391_v32, %v3672_v36  ;;  %2619 = vmatmul.mubr.f32.gmra.mrb[18].mxu1 %v687_v37  ;;  %2771 = vmatprep.mubr.f32.mxu0 %v695_v41  ;;  %v316_v46 = vpop.trf.xlu0  ;;  %v696_v50 = vsub.f32 %v3668_v25, %v695_v41 }
 0x135   : > { %v394_v51 = vsel %vm326_vm1, %v316_v46, 0 }
 0x136   : > { %4055 = vst [vmem:[#allocation14_spill] sm:$0xff] %v3676_v44  ;;  %v3680_v55 = vand.u32 4294901760, %v394_v51  ;;  %v697_v57 = vand.u32 4294901760, %v696_v50  ;;  %v705_v60 = vand.u32 4294901760, %v3676_v44 }
 0x138   : > { %v3684_v0 = vsub.f32 %v394_v51, %v3680_v55  ;;  %2621 = vmatprep.mubr.f32.mxu1 %v697_v57  ;;  %2772 = vmatmul.mubr.f32.gmra.mrb[20].mxu0 %v705_v60  ;;  %v317_v1 = vpop.trf.xlu0  ;;  %v706_v7 = vsub.f32 %v3676_v44, %v705_v60 }
 0x139   : > { %v397_v9 = vsel %vm326_vm1, %v317_v1, 0 }
 0x13a   : > { %4056 = vst [vmem:[#allocation15_spill] sm:$0xff] %v3684_v0  ;;  %v3688_v14 = vand.u32 4294901760, %v397_v9  ;;  %v707_v18 = vand.u32 4294901760, %v706_v7  ;;  %v715_v22 = vand.u32 4294901760, %v3684_v0 }
 0x13c   : > { %v3692_v27 = vsub.f32 %v397_v9, %v3688_v14  ;;  %2622 = vmatmul.mubr.f32.gmra.mrb[20].mxu1 %v707_v18  ;;  %2774 = vmatprep.mubr.f32.mxu0 %v715_v22  ;;  %v318_v30 = vpop.trf.xlu0  ;;  %v716_v32 = vsub.f32 %v3684_v0, %v715_v22 }
 0x13d   : > { %v400_v37 = vsel %vm326_vm1, %v318_v30, 0 }
 0x13e   : > { %4057 = vst [vmem:[#allocation16_spill] sm:$0xff] %v3692_v27  ;;  %v3696_v41 = vand.u32 4294901760, %v400_v37  ;;  %v717_v46 = vand.u32 4294901760, %v716_v32  ;;  %v725_v50 = vand.u32 4294901760, %v3692_v27 }
 0x140   : > { %v3700_v51 = vsub.f32 %v400_v37, %v3696_v41  ;;  %2624 = vmatprep.mubr.f32.mxu1 %v717_v46  ;;  %2775 = vmatmul.mubr.f32.gmra.mrb[22].mxu0 %v725_v50  ;;  %v319_v57 = vpop.trf.xlu0  ;;  %v726_v60 = vsub.f32 %v3692_v27, %v725_v50 }
 0x141   : > { %v403_v1 = vsel %vm326_vm1, %v319_v57, 0 }
 0x142   : > { %4058 = vst [vmem:[#allocation17_spill] sm:$0xff] %v3700_v51  ;;  %v3704_v7 = vand.u32 4294901760, %v403_v1  ;;  %v727_v9 = vand.u32 4294901760, %v726_v60  ;;  %v735_v18 = vand.u32 4294901760, %v3700_v51 }
 0x144   : > { %v3708_v22 = vsub.f32 %v403_v1, %v3704_v7  ;;  %2625 = vmatmul.mubr.f32.gmra.mrb[22].mxu1 %v727_v9  ;;  %2777 = vmatprep.mubr.f32.mxu0 %v735_v18  ;;  %v320_v30 = vpop.trf.xlu0  ;;  %v736_v32 = vsub.f32 %v3700_v51, %v735_v18 }
 0x145   : > { %v406_v37 = vsel %vm326_vm1, %v320_v30, 0 }
 0x146   : > { %4059 = vst [vmem:[#allocation18_spill] sm:$0xff] %v3708_v22  ;;  %v3712_v46 = vand.u32 4294901760, %v406_v37  ;;  %v737_v50 = vand.u32 4294901760, %v736_v32  ;;  %v745_v57 = vand.u32 4294901760, %v3708_v22 }
 0x148   : > { %v3716_v27 = vsub.f32 %v406_v37, %v3712_v46  ;;  %2627 = vmatprep.mubr.f32.mxu1 %v737_v50  ;;  %2778 = vmatmul.mubr.f32.gmra.mrb[24].mxu0 %v745_v57  ;;  %v321_v60 = vpop.trf.xlu0  ;;  %v746_v1 = vsub.f32 %v3708_v22, %v745_v57 }
 0x149   : > { %v409_v9 = vsel %vm326_vm1, %v321_v60, 0 }
 0x14a   : > { %4060 = vst [vmem:[#allocation19_spill] sm:$0xff] %v3716_v27  ;;  %v3720_v0 = vand.u32 4294901760, %v409_v9  ;;  %v747_v18 = vand.u32 4294901760, %v746_v1  ;;  %v755_v30 = vand.u32 4294901760, %v3716_v27 }
 0x14c   : > { %v3724_v51 = vsub.f32 %v409_v9, %v3720_v0  ;;  %2628 = vmatmul.mubr.f32.gmra.mrb[24].mxu1 %v747_v18  ;;  %2780 = vmatprep.mubr.f32.mxu0 %v755_v30  ;;  %v322_v32 = vpop.trf.xlu0  ;;  %v756_v37 = vsub.f32 %v3716_v27, %v755_v30 }
 0x14d   : > { %v412_v50 = vsel %vm326_vm1, %v322_v32, 0 }
 0x14e   : > { %4061 = vst [vmem:[#allocation20_spill] sm:$0xff] %v3724_v51  ;;  %v3728_v44 = vand.u32 4294901760, %v412_v50  ;;  %v757_v57 = vand.u32 4294901760, %v756_v37  ;;  %v765_v60 = vand.u32 4294901760, %v3724_v51 }
 0x150   : > { %v3732_v22 = vsub.f32 %v412_v50, %v3728_v44  ;;  %2630 = vmatprep.mubr.f32.mxu1 %v757_v57  ;;  %2781 = vmatmul.mubr.f32.gmra.mrb[26].mxu0 %v765_v60  ;;  %v323_v1 = vpop.trf.xlu0  ;;  %v766_v9 = vsub.f32 %v3724_v51, %v765_v60 }
 0x151   : > { %v415_v18 = vsel %vm326_vm1, %v323_v1, 0 }
 0x152   : > { %4062 = vst [vmem:[#allocation21_spill] sm:$0xff] %v3732_v22  ;;  %v3736_v25 = vand.u32 4294901760, %v415_v18  ;;  %v767_v30 = vand.u32 4294901760, %v766_v9  ;;  %v775_v32 = vand.u32 4294901760, %v3732_v22 }
 0x154   : > { %v3740_v27 = vsub.f32 %v415_v18, %v3736_v25  ;;  %2631 = vmatmul.mubr.f32.gmra.mrb[26].mxu1 %v767_v30  ;;  %2783 = vmatprep.mubr.f32.mxu0 %v775_v32  ;;  %v324_v37 = vpop.trf.xlu0  ;;  %v776_v50 = vsub.f32 %v3732_v22, %v775_v32 }
 0x155   : > { %v418_v57 = vsel %vm326_vm1, %v324_v37, 0 }
 0x156   : > { %v3744_v4 = vand.u32 4294901760, %v418_v57  ;;  %v777_v60 = vand.u32 4294901760, %v776_v50  ;;  %v785_v1 = vand.u32 4294901760, %v3740_v27 }
 0x158   : > { %v3748_v51 = vsub.f32 %v418_v57, %v3744_v4  ;;  %2633 = vmatprep.mubr.f32.mxu1 %v777_v60  ;;  %2784 = vmatmul.mubr.f32.gmra.mrb[28].mxu0 %v785_v1  ;;  %v325_v9 = vpop.trf.xlu0  ;;  %v786_v18 = vsub.f32 %v3740_v27, %v785_v1 }
 0x159   : > { %v421_v30 = vsel %vm326_vm1, %v325_v9, 0 }
 0x15a   : > { %v3752_v54 = vand.u32 4294901760, %v421_v30  ;;  %v787_v32 = vand.u32 4294901760, %v786_v18  ;;  %v795_v37 = vand.u32 4294901760, %v3748_v51 }
 0x15c   : > { %v3756_v22 = vsub.f32 %v421_v30, %v3752_v54  ;;  %2634 = vmatmul.mubr.f32.gmra.mrb[28].mxu1 %v787_v32  ;;  %2786 = vmatprep.mubr.f32.mxu0 %v795_v37  ;;  %v796_v50 = vsub.f32 %v3748_v51, %v795_v37 }
 0x15e   : > { %v797_v57 = vand.u32 4294901760, %v796_v50  ;;  %v805_v60 = vand.u32 4294901760, %v3756_v22 }
 0x160   : > { %2636 = vmatprep.mubr.f32.mxu1 %v797_v57  ;;  %2787 = vmatmul.mubr.f32.gmra.mrb[30].mxu0 %v805_v60  ;;  %v806_v1 = vsub.f32 %v3756_v22, %v805_v60 }
 0x161   : > { %2791 = vmatprep.mubr.f32.mxu0 %v3504_v11 }
 0x162   : > { %v807_v9 = vand.u32 4294901760, %v806_v1 }
 0x164   : > { %2637 = vmatmul.mubr.f32.gmra.mrb[30].mxu1 %v807_v9  ;;  %2792 = vmatmul.mubr.f32.vlgmr.msra.gmra.mrb[0].mxu0 %v3510_v15 }
 0x165   : > { %2641 = vmatprep.mubr.f32.mxu1 %v3504_v11  ;;  %2794 = vmatprep.mubr.f32.mxu0 %v3518_v21 }
 0x166   : > { %2840 = vmatpush3.msra.mxu0 %v3492_v3  ;;  %v4063_v3 = vld [vmem:[#allocation11_spill] sm:$0xff] }
 0x168   : > { %2642 = vmatmul.mubr.f32.vlgmr.msra.gmra.mrb[0].mxu1 %v3510_v15  ;;  %2795 = vmatmul.mubr.f32.gmra.mrb[2].mxu0 %v3526_v28 }
 0x169   : > { %2690 = vmatpush3.msra.mxu1 %v3499_v5  ;;  %2644 = vmatprep.mubr.f32.mxu1 %v3518_v21  ;;  %v4064_v5 = vld [vmem:[#allocation12_spill] sm:$0xff] }
 0x16a   : > { %2797 = vmatprep.mubr.f32.mxu0 %v3535_v35 }
 0x16c   : > { %2645 = vmatmul.mubr.f32.gmra.mrb[2].mxu1 %v3526_v28  ;;  %2798 = vmatmul.mubr.f32.gmra.mrb[4].mxu0 %v3544_v42 }
 0x16d   : > { %2647 = vmatprep.mubr.f32.mxu1 %v3535_v35  ;;  %2800 = vmatprep.mubr.f32.mxu0 %v3552_v49 }
 0x170   : > { %2648 = vmatmul.mubr.f32.gmra.mrb[4].mxu1 %v3544_v42  ;;  %2801 = vmatmul.mubr.f32.gmra.mrb[6].mxu0 %v3560_v56 }
 0x171   : > { %2650 = vmatprep.mubr.f32.mxu1 %v3552_v49  ;;  %2803 = vmatprep.mubr.f32.mxu0 %v3568_v63 }
 0x174   : > { %2651 = vmatmul.mubr.f32.gmra.mrb[6].mxu1 %v3560_v56  ;;  %2804 = vmatmul.mubr.f32.gmra.mrb[8].mxu0 %v3576_v8 }
 0x175   : > { %2653 = vmatprep.mubr.f32.mxu1 %v3568_v63  ;;  %2806 = vmatprep.mubr.f32.mxu0 %v3584_v19 }
 0x178   : > { %2654 = vmatmul.mubr.f32.gmra.mrb[8].mxu1 %v3576_v8  ;;  %2807 = vmatmul.mubr.f32.gmra.mrb[10].mxu0 %v3592_v29 }
 0x179   : > { %2656 = vmatprep.mubr.f32.mxu1 %v3584_v19  ;;  %2809 = vmatprep.mubr.f32.mxu0 %v3600_v39 }
 0x17c   : > { %2657 = vmatmul.mubr.f32.gmra.mrb[10].mxu1 %v3592_v29  ;;  %2810 = vmatmul.mubr.f32.gmra.mrb[12].mxu0 %v3608_v48 }
 0x17d   : > { %2659 = vmatprep.mubr.f32.mxu1 %v3600_v39  ;;  %2812 = vmatprep.mubr.f32.mxu0 %v3616_v58 }
 0x180   : > { %2660 = vmatmul.mubr.f32.gmra.mrb[12].mxu1 %v3608_v48  ;;  %2813 = vmatmul.mubr.f32.gmra.mrb[14].mxu0 %v3624_v6 }
 0x181   : > { %2662 = vmatprep.mubr.f32.mxu1 %v3616_v58  ;;  %2815 = vmatprep.mubr.f32.mxu0 %v3632_v20 }
 0x184   : > { %2663 = vmatmul.mubr.f32.gmra.mrb[14].mxu1 %v3624_v6  ;;  %2816 = vmatmul.mubr.f32.gmra.mrb[16].mxu0 %v3640_v34 }
 0x185   : > { %2665 = vmatprep.mubr.f32.mxu1 %v3632_v20  ;;  %2818 = vmatprep.mubr.f32.mxu0 %v3648_v47 }
 0x188   : > { %2666 = vmatmul.mubr.f32.gmra.mrb[16].mxu1 %v3640_v34  ;;  %2819 = vmatmul.mubr.f32.gmra.mrb[18].mxu0 %v3656_v61 }
 0x189   : > { %2668 = vmatprep.mubr.f32.mxu1 %v3648_v47  ;;  %2821 = vmatprep.mubr.f32.mxu0 %v3664_v16 }
 0x18c   : > { %2669 = vmatmul.mubr.f32.gmra.mrb[18].mxu1 %v3656_v61  ;;  %2822 = vmatmul.mubr.f32.gmra.mrb[20].mxu0 %v3672_v36 }
 0x18d   : > { %2671 = vmatprep.mubr.f32.mxu1 %v3664_v16  ;;  %2824 = vmatprep.mubr.f32.mxu0 %v3680_v55 }
 0x190   : > { %2672 = vmatmul.mubr.f32.gmra.mrb[20].mxu1 %v3672_v36  ;;  %2825 = vmatmul.mubr.f32.gmra.mrb[22].mxu0 %v3688_v14 }
 0x191   : > { %2674 = vmatprep.mubr.f32.mxu1 %v3680_v55  ;;  %2827 = vmatprep.mubr.f32.mxu0 %v3696_v41 }
 0x194   : > { %2675 = vmatmul.mubr.f32.gmra.mrb[22].mxu1 %v3688_v14  ;;  %2828 = vmatmul.mubr.f32.gmra.mrb[24].mxu0 %v3704_v7 }
 0x195   : > { %2677 = vmatprep.mubr.f32.mxu1 %v3696_v41  ;;  %2830 = vmatprep.mubr.f32.mxu0 %v3712_v46 }
 0x198   : > { %2678 = vmatmul.mubr.f32.gmra.mrb[24].mxu1 %v3704_v7  ;;  %2831 = vmatmul.mubr.f32.gmra.mrb[26].mxu0 %v3720_v0 }
 0x199   : > { %2680 = vmatprep.mubr.f32.mxu1 %v3712_v46  ;;  %2833 = vmatprep.mubr.f32.mxu0 %v3728_v44 }
 0x19c   : > { %2681 = vmatmul.mubr.f32.gmra.mrb[26].mxu1 %v3720_v0  ;;  %2834 = vmatmul.mubr.f32.gmra.mrb[28].mxu0 %v3736_v25 }
 0x19d   : > { %2683 = vmatprep.mubr.f32.mxu1 %v3728_v44  ;;  %2836 = vmatprep.mubr.f32.mxu0 %v3744_v4 }
 0x1a0   : > { %2684 = vmatmul.mubr.f32.gmra.mrb[28].mxu1 %v3736_v25  ;;  %2837 = vmatmul.mubr.f32.gmra.mrb[30].mxu0 %v3752_v54 }
 0x1a1   : > { %2686 = vmatprep.mubr.f32.mxu1 %v3744_v4  ;;  %2841 = vmatprep.mubr.f32.mxu0 %v3504_v11  ;;  %v4065_v11 = vld [vmem:[#allocation13_spill] sm:$0xff] }
 0x1a4   : > { %2687 = vmatmul.mubr.f32.gmra.mrb[30].mxu1 %v3752_v54  ;;  %2842 = vmatmul.mubr.f32.vlgmr.msra.gmra.mrb[0].mxu0 %v3510_v15  ;;  %v4067_v15 = vld [vmem:[#allocation15_spill] sm:$0xff] }
 0x1a5   : > { %2691 = vmatprep.mubr.f32.mxu1 %v3507_v12  ;;  %2844 = vmatprep.mubr.f32.mxu0 %v3518_v21  ;;  %v4066_v12 = vld [vmem:[#allocation14_spill] sm:$0xff]  ;;  %v4069_v21 = vld [vmem:[#allocation17_spill] sm:$0xff] }
 0x1a8   : > { %2692 = vmatmul.mubr.f32.vlgmr.msra.gmra.mrb[0].mxu1 %v3514_v17  ;;  %2845 = vmatmul.mubr.f32.gmra.mrb[2].mxu0 %v3526_v28  ;;  %v4068_v17 = vld [vmem:[#allocation16_spill] sm:$0xff]  ;;  %v4071_v28 = vld [vmem:[#allocation19_spill] sm:$0xff] }
 0x1a9   : > { %2694 = vmatprep.mubr.f32.mxu1 %v3522_v24  ;;  %2847 = vmatprep.mubr.f32.mxu0 %v3535_v35  ;;  %v4070_v24 = vld [vmem:[#allocation18_spill] sm:$0xff]  ;;  %v4073_v35 = vld [vmem:[#allocation21_spill] sm:$0xff] }
 0x1ac   : > { %2695 = vmatmul.mubr.f32.gmra.mrb[2].mxu1 %v3531_v31  ;;  %2848 = vmatmul.mubr.f32.gmra.mrb[4].mxu0 %v3544_v42  ;;  %v4072_v31 = vld [vmem:[#allocation20_spill] sm:$0xff] }
 0x1ad   : > { %2697 = vmatprep.mubr.f32.mxu1 %v3540_v38  ;;  %2850 = vmatprep.mubr.f32.mxu0 %v3552_v49 }
 0x1b0   : > { %2698 = vmatmul.mubr.f32.gmra.mrb[4].mxu1 %v3548_v45  ;;  %2851 = vmatmul.mubr.f32.gmra.mrb[6].mxu0 %v3560_v56  ;;  %v3894_v45 = vld [vmem:[%s4021_s2] ss:$0 sm:$0xff] }
 0x1b1   : > { %2700 = vmatprep.mubr.f32.mxu1 %v3556_v52  ;;  %2853 = vmatprep.mubr.f32.mxu0 %v3568_v63 }
 0x1b4   : > { %2701 = vmatmul.mubr.f32.gmra.mrb[6].mxu1 %v3564_v59  ;;  %2854 = vmatmul.mubr.f32.gmra.mrb[8].mxu0 %v3576_v8 }
 0x1b5   : > { %2703 = vmatprep.mubr.f32.mxu1 %v3572_v2  ;;  %2856 = vmatprep.mubr.f32.mxu0 %v3584_v19 }
 0x1b8   : > { %2704 = vmatmul.mubr.f32.gmra.mrb[8].mxu1 %v3580_v13  ;;  %2857 = vmatmul.mubr.f32.gmra.mrb[10].mxu0 %v3592_v29 }
 0x1b9   : > { %2706 = vmatprep.mubr.f32.mxu1 %v3588_v23  ;;  %2859 = vmatprep.mubr.f32.mxu0 %v3600_v39 }
 0x1bc   : > { %2707 = vmatmul.mubr.f32.gmra.mrb[10].mxu1 %v3596_v33  ;;  %2860 = vmatmul.mubr.f32.gmra.mrb[12].mxu0 %v3608_v48 }
 0x1bd   : > { %2709 = vmatprep.mubr.f32.mxu1 %v3604_v43  ;;  %2862 = vmatprep.mubr.f32.mxu0 %v3616_v58 }
 0x1c0   : > { %2710 = vmatmul.mubr.f32.gmra.mrb[12].mxu1 %v3612_v53  ;;  %2863 = vmatmul.mubr.f32.gmra.mrb[14].mxu0 %v3624_v6 }
 0x1c1   : > { %2712 = vmatprep.mubr.f32.mxu1 %v3620_v62  ;;  %2865 = vmatprep.mubr.f32.mxu0 %v3632_v20 }
 0x1c4   : > { %2713 = vmatmul.mubr.f32.gmra.mrb[14].mxu1 %v3628_v10  ;;  %2866 = vmatmul.mubr.f32.gmra.mrb[16].mxu0 %v3640_v34 }
 0x1c5   : > { %2715 = vmatprep.mubr.f32.mxu1 %v3636_v26  ;;  %2868 = vmatprep.mubr.f32.mxu0 %v3648_v47 }
 0x1c8   : > { %2716 = vmatmul.mubr.f32.gmra.mrb[16].mxu1 %v3644_v40  ;;  %2869 = vmatmul.mubr.f32.gmra.mrb[18].mxu0 %v3656_v61 }
 0x1c9   : > { %2718 = vmatprep.mubr.f32.mxu1 %v4063_v3  ;;  %2871 = vmatprep.mubr.f32.mxu0 %v3664_v16 }
 0x1cc   : > { %2719 = vmatmul.mubr.f32.gmra.mrb[18].mxu1 %v4064_v5  ;;  %2872 = vmatmul.mubr.f32.gmra.mrb[20].mxu0 %v3672_v36 }
 0x1cd   : > { %2721 = vmatprep.mubr.f32.mxu1 %v4065_v11  ;;  %2874 = vmatprep.mubr.f32.mxu0 %v3680_v55 }
 0x1d0   : > { %2722 = vmatmul.mubr.f32.gmra.mrb[20].mxu1 %v4066_v12  ;;  %2875 = vmatmul.mubr.f32.gmra.mrb[22].mxu0 %v3688_v14 }
 0x1d1   : > { %2724 = vmatprep.mubr.f32.mxu1 %v4067_v15  ;;  %2877 = vmatprep.mubr.f32.mxu0 %v3696_v41 }
 0x1d4   : > { %2725 = vmatmul.mubr.f32.gmra.mrb[22].mxu1 %v4068_v17  ;;  %2878 = vmatmul.mubr.f32.gmra.mrb[24].mxu0 %v3704_v7 }
 0x1d5   : > { %2727 = vmatprep.mubr.f32.mxu1 %v4069_v21  ;;  %2880 = vmatprep.mubr.f32.mxu0 %v3712_v46 }
 0x1d8   : > { %2728 = vmatmul.mubr.f32.gmra.mrb[24].mxu1 %v4070_v24  ;;  %2881 = vmatmul.mubr.f32.gmra.mrb[26].mxu0 %v3720_v0 }
 0x1d9   : > { %2730 = vmatprep.mubr.f32.mxu1 %v4071_v28  ;;  %2883 = vmatprep.mubr.f32.mxu0 %v3728_v44 }
 0x1dc   : > { %2731 = vmatmul.mubr.f32.gmra.mrb[26].mxu1 %v4072_v31  ;;  %2884 = vmatmul.mubr.f32.gmra.mrb[28].mxu0 %v3736_v25 }
 0x1dd   : > { %2733 = vmatprep.mubr.f32.mxu1 %v4073_v35  ;;  %2886 = vmatprep.mubr.f32.mxu0 %v3744_v4 }
 0x1e0   : > { %2734 = vmatmul.mubr.f32.gmra.mrb[28].mxu1 %v3740_v27  ;;  %2887 = vmatmul.mubr.f32.gmra.mrb[30].mxu0 %v3752_v54 }
 0x1e1   : > { %2736 = vmatprep.mubr.f32.mxu1 %v3748_v51 }
 0x1e4   : > { %2737 = vmatmul.mubr.f32.gmra.mrb[30].mxu1 %v3756_v22 }
 0x277   : > { %v2843_v38 = vpop.f32.mrb[0].mxu0 }
 0x278   : > { %v2016_v42 = vpop.f32.mrb[1].mxu0 }
 0x27b   : > { %v2693_v49 = vpop.f32.mrb[0].mxu1  ;;  %v2846_v52 = vpop.f32.mrb[2].mxu0 }
 0x27c   : > { %v2889_v56 = vadd.f32 %v2693_v49, %v3894_v45  ;;  %v1145_v59 = vpop.f32.mrb[1].mxu1  ;;  %v2028_v63 = vpop.f32.mrb[3].mxu0 }
 0x27d   : > { %v2891_v2 = vadd.f32 %v3894_v45, %v1145_v59 }
 0x27e   : > { %v2890_v8 = vadd.f32 %v2889_v56, %v2843_v38 }
 0x27f   : > { %v2892_v13 = vadd.f32 %v2891_v2, %v2016_v42  ;;  %v2696_v19 = vpop.f32.mrb[2].mxu1  ;;  %v2849_v23 = vpop.f32.mrb[4].mxu0 }
 0x280   : > { %2207 = vst [vmem:[%s3899_s8 + $0x8] sm:$0xff] %v2890_v8  ;;  %v2893_v29 = vadd.f32 %v2696_v19, %v3894_v45  ;;  %v1159_v33 = vpop.f32.mrb[3].mxu1  ;;  %v2040_v39 = vpop.f32.mrb[5].mxu0 }
 0x281   : > { %2206 = vst [vmem:[%s3899_s8] sm:$0xff] %v2892_v13  ;;  %v2895_v43 = vadd.f32 %v3894_v45, %v1159_v33 }
 0x282   : > { %v2894_v48 = vadd.f32 %v2893_v29, %v2846_v52 }
 0x283   : > { %v2896_v53 = vadd.f32 %v2895_v43, %v2028_v63  ;;  %v2699_v58 = vpop.f32.mrb[4].mxu1  ;;  %v2852_v62 = vpop.f32.mrb[6].mxu0 }
 0x284   : > { %2209 = vst [vmem:[%s3899_s8 + $0x18] sm:$0xff] %v2894_v48  ;;  %v2897_v6 = vadd.f32 %v2699_v58, %v3894_v45  ;;  %v1173_v10 = vpop.f32.mrb[5].mxu1  ;;  %v2052_v20 = vpop.f32.mrb[7].mxu0 }
 0x285   : > { %2208 = vst [vmem:[%s3899_s8 + $0x10] sm:$0xff] %v2896_v53  ;;  %v2899_v26 = vadd.f32 %v3894_v45, %v1173_v10 }
 0x286   : > { %v2898_v34 = vadd.f32 %v2897_v6, %v2849_v23 }
 0x287   : > { %v2900_v40 = vadd.f32 %v2899_v26, %v2040_v39  ;;  %v2702_v47 = vpop.f32.mrb[6].mxu1  ;;  %v2855_v54 = vpop.f32.mrb[8].mxu0 }
 0x288   : > { %2211 = vst [vmem:[%s3899_s8 + $0x28] sm:$0xff] %v2898_v34  ;;  %v2901_v61 = vadd.f32 %v2702_v47, %v3894_v45  ;;  %v1187_v4 = vpop.f32.mrb[7].mxu1  ;;  %v2064_v16 = vpop.f32.mrb[9].mxu0 }
 0x289   : > { %2210 = vst [vmem:[%s3899_s8 + $0x20] sm:$0xff] %v2900_v40  ;;  %v2903_v25 = vadd.f32 %v3894_v45, %v1187_v4 }
 0x28a   : > { %v2902_v36 = vadd.f32 %v2901_v61, %v2852_v62 }
 0x28b   : > { %v2904_v44 = vadd.f32 %v2903_v25, %v2052_v20  ;;  %v2705_v55 = vpop.f32.mrb[8].mxu1  ;;  %v2858_v0 = vpop.f32.mrb[10].mxu0 }
 0x28c   : > { %2213 = vst [vmem:[%s3899_s8 + $0x38] sm:$0xff] %v2902_v36  ;;  %v2905_v14 = vadd.f32 %v2705_v55, %v3894_v45  ;;  %v1201_v27 = vpop.f32.mrb[9].mxu1  ;;  %v2076_v41 = vpop.f32.mrb[11].mxu0 }
 0x28d   : > { %2212 = vst [vmem:[%s3899_s8 + $0x30] sm:$0xff] %v2904_v44  ;;  %v2907_v51 = vadd.f32 %v3894_v45, %v1201_v27 }
 0x28e   : > { %v2906_v7 = vadd.f32 %v2905_v14, %v2855_v54 }
 0x28f   : > { %v2908_v22 = vadd.f32 %v2907_v51, %v2064_v16  ;;  %v2708_v46 = vpop.f32.mrb[10].mxu1  ;;  %v2861_v18 = vpop.f32.mrb[12].mxu0 }
 0x290   : > { %2215 = vst [vmem:[%s3899_s8 + $0x48] sm:$0xff] %v2906_v7  ;;  %v2909_v30 = vadd.f32 %v2708_v46, %v3894_v45  ;;  %v1215_v32 = vpop.f32.mrb[11].mxu1  ;;  %v2088_v37 = vpop.f32.mrb[13].mxu0 }
 0x291   : > { %2214 = vst [vmem:[%s3899_s8 + $0x40] sm:$0xff] %v2908_v22  ;;  %v2911_v50 = vadd.f32 %v3894_v45, %v1215_v32 }
 0x292   : > { %v2910_v57 = vadd.f32 %v2909_v30, %v2858_v0 }
 0x293   : > { %v2912_v60 = vadd.f32 %v2911_v50, %v2076_v41  ;;  %v2711_v1 = vpop.f32.mrb[12].mxu1  ;;  %v2864_v9 = vpop.f32.mrb[14].mxu0 }
 0x294   : > { %2217 = vst [vmem:[%s3899_s8 + $0x58] sm:$0xff] %v2910_v57  ;;  %v2913_v3 = vadd.f32 %v2711_v1, %v3894_v45  ;;  %v1229_v5 = vpop.f32.mrb[13].mxu1  ;;  %v2100_v11 = vpop.f32.mrb[15].mxu0 }
 0x295   : > { %2216 = vst [vmem:[%s3899_s8 + $0x50] sm:$0xff] %v2912_v60  ;;  %v2915_v12 = vadd.f32 %v3894_v45, %v1229_v5 }
 0x296   : > { %v2914_v15 = vadd.f32 %v2913_v3, %v2861_v18 }
 0x297   : > { %v2916_v17 = vadd.f32 %v2915_v12, %v2088_v37  ;;  %v2714_v21 = vpop.f32.mrb[14].mxu1  ;;  %v2867_v24 = vpop.f32.mrb[16].mxu0 }
 0x298   : > { %2219 = vst [vmem:[%s3899_s8 + $0x68] sm:$0xff] %v2914_v15  ;;  %v2917_v28 = vadd.f32 %v2714_v21, %v3894_v45  ;;  %v1243_v31 = vpop.f32.mrb[15].mxu1  ;;  %v2112_v35 = vpop.f32.mrb[17].mxu0 }
 0x299   : > { %2218 = vst [vmem:[%s3899_s8 + $0x60] sm:$0xff] %v2916_v17  ;;  %v2919_v38 = vadd.f32 %v3894_v45, %v1243_v31 }
 0x29a   : > { %v2918_v42 = vadd.f32 %v2917_v28, %v2864_v9 }
 0x29b   : > { %v2920_v49 = vadd.f32 %v2919_v38, %v2100_v11  ;;  %v2717_v52 = vpop.f32.mrb[16].mxu1  ;;  %v2870_v56 = vpop.f32.mrb[18].mxu0 }
 0x29c   : > { %2221 = vst [vmem:[%s3899_s8 + $0x78] sm:$0xff] %v2918_v42  ;;  %v2921_v59 = vadd.f32 %v2717_v52, %v3894_v45  ;;  %v1257_v63 = vpop.f32.mrb[17].mxu1  ;;  %v2124_v2 = vpop.f32.mrb[19].mxu0 }
 0x29d   : > { %2220 = vst [vmem:[%s3899_s8 + $0x70] sm:$0xff] %v2920_v49  ;;  %v2923_v8 = vadd.f32 %v3894_v45, %v1257_v63 }
 0x29e   : > { %v2922_v13 = vadd.f32 %v2921_v59, %v2867_v24 }
 0x29f   : > { %v2924_v19 = vadd.f32 %v2923_v8, %v2112_v35  ;;  %v2720_v23 = vpop.f32.mrb[18].mxu1  ;;  %v2873_v29 = vpop.f32.mrb[20].mxu0 }
 0x2a0   : > { %2223 = vst [vmem:[%s3899_s8 + $0x88] sm:$0xff] %v2922_v13  ;;  %v2925_v33 = vadd.f32 %v2720_v23, %v3894_v45  ;;  %v1271_v39 = vpop.f32.mrb[19].mxu1  ;;  %v2136_v43 = vpop.f32.mrb[21].mxu0 }
 0x2a1   : > { %2222 = vst [vmem:[%s3899_s8 + $0x80] sm:$0xff] %v2924_v19  ;;  %v2927_v48 = vadd.f32 %v3894_v45, %v1271_v39 }
 0x2a2   : > { %v2926_v53 = vadd.f32 %v2925_v33, %v2870_v56 }
 0x2a3   : > { %v2928_v58 = vadd.f32 %v2927_v48, %v2124_v2  ;;  %v2723_v62 = vpop.f32.mrb[20].mxu1  ;;  %v2876_v6 = vpop.f32.mrb[22].mxu0 }
 0x2a4   : > { %2225 = vst [vmem:[%s3899_s8 + $0x98] sm:$0xff] %v2926_v53  ;;  %v2929_v10 = vadd.f32 %v2723_v62, %v3894_v45  ;;  %v1285_v20 = vpop.f32.mrb[21].mxu1  ;;  %v2148_v26 = vpop.f32.mrb[23].mxu0 }
 0x2a5   : > { %2224 = vst [vmem:[%s3899_s8 + $0x90] sm:$0xff] %v2928_v58  ;;  %v2931_v34 = vadd.f32 %v3894_v45, %v1285_v20 }
 0x2a6   : > { %v2930_v40 = vadd.f32 %v2929_v10, %v2873_v29 }
 0x2a7   : > { %v2932_v47 = vadd.f32 %v2931_v34, %v2136_v43  ;;  %v2726_v54 = vpop.f32.mrb[22].mxu1  ;;  %v2879_v61 = vpop.f32.mrb[24].mxu0 }
 0x2a8   : > { %2227 = vst [vmem:[%s3899_s8 + $0xa8] sm:$0xff] %v2930_v40  ;;  %v2933_v4 = vadd.f32 %v2726_v54, %v3894_v45  ;;  %v1299_v16 = vpop.f32.mrb[23].mxu1  ;;  %v2160_v25 = vpop.f32.mrb[25].mxu0 }
 0x2a9   : > { %2226 = vst [vmem:[%s3899_s8 + $0xa0] sm:$0xff] %v2932_v47  ;;  %v2935_v36 = vadd.f32 %v3894_v45, %v1299_v16 }
 0x2aa   : > { %v2934_v44 = vadd.f32 %v2933_v4, %v2876_v6 }
 0x2ab   : > { %v2936_v55 = vadd.f32 %v2935_v36, %v2148_v26  ;;  %v2729_v0 = vpop.f32.mrb[24].mxu1  ;;  %v2882_v14 = vpop.f32.mrb[26].mxu0 }
 0x2ac   : > { %2229 = vst [vmem:[%s3899_s8 + $0xb8] sm:$0xff] %v2934_v44  ;;  %v2937_v27 = vadd.f32 %v2729_v0, %v3894_v45  ;;  %v1313_v41 = vpop.f32.mrb[25].mxu1  ;;  %v2172_v51 = vpop.f32.mrb[27].mxu0 }
 0x2ad   : > { %2228 = vst [vmem:[%s3899_s8 + $0xb0] sm:$0xff] %v2936_v55  ;;  %v2939_v7 = vadd.f32 %v3894_v45, %v1313_v41 }
 0x2ae   : > { %v2938_v22 = vadd.f32 %v2937_v27, %v2879_v61 }
 0x2af   : > { %v2940_v46 = vadd.f32 %v2939_v7, %v2160_v25  ;;  %v2732_v18 = vpop.f32.mrb[26].mxu1  ;;  %v2885_v30 = vpop.f32.mrb[28].mxu0 }
 0x2b0   : > { %2231 = vst [vmem:[%s3899_s8 + $0xc8] sm:$0xff] %v2938_v22  ;;  %v2941_v32 = vadd.f32 %v2732_v18, %v3894_v45  ;;  %v1327_v37 = vpop.f32.mrb[27].mxu1  ;;  %v2184_v50 = vpop.f32.mrb[29].mxu0 }
 0x2b1   : > { %2230 = vst [vmem:[%s3899_s8 + $0xc0] sm:$0xff] %v2940_v46  ;;  %v2943_v57 = vadd.f32 %v3894_v45, %v1327_v37 }
 0x2b2   : > { %v2942_v60 = vadd.f32 %v2941_v32, %v2882_v14 }
 0x2b3   : > { %v2944_v1 = vadd.f32 %v2943_v57, %v2172_v51  ;;  %v2735_v9 = vpop.f32.mrb[28].mxu1  ;;  %v2888_v3 = vpop.f32.mrb[30].mxu0 }
 0x2b4   : > { %2233 = vst [vmem:[%s3899_s8 + $0xd8] sm:$0xff] %v2942_v60  ;;  %v2945_v5 = vadd.f32 %v2735_v9, %v3894_v45  ;;  %v1341_v11 = vpop.f32.mrb[29].mxu1  ;;  %v2196_v12 = vpop.f32.mrb[31].mxu0 }
 0x2b5   : > { %2232 = vst [vmem:[%s3899_s8 + $0xd0] sm:$0xff] %v2944_v1  ;;  %v2947_v15 = vadd.f32 %v3894_v45, %v1341_v11 }
 0x2b6   : > { %v2946_v17 = vadd.f32 %v2945_v5, %v2885_v30 }
 0x2b7   : > { %v2948_v21 = vadd.f32 %v2947_v15, %v2184_v50  ;;  %v2738_v24 = vpop.f32.mrb[30].mxu1 }
 0x2b8   : > { %2235 = vst [vmem:[%s3899_s8 + $0xe8] sm:$0xff] %v2946_v17  ;;  %v2949_v28 = vadd.f32 %v2738_v24, %v3894_v45  ;;  %v1355_v31 = vpop.f32.mrb[31].mxu1 }
 0x2b9   : > { %2234 = vst [vmem:[%s3899_s8 + $0xe0] sm:$0xff] %v2948_v21  ;;  %v2951_v35 = vadd.f32 %v3894_v45, %v1355_v31 }
 0x2ba   : > { %v2950_v38 = vadd.f32 %v2949_v28, %v2888_v3 }
 0x2bb   : > { %v2952_v42 = vadd.f32 %v2951_v35, %v2196_v12 }
 0x2bc   : > { %2237 = vst [vmem:[%s3899_s8 + $0xf8] sm:$0xff] %v2950_v38 }
 0x2bd   : > { %2236 = vst [vmem:[%s3899_s8 + $0xf0] sm:$0xff] %v2952_v42 }
 0x2be   : > { %3229 = shalt.err (!%p3226_p5)
}
 0x2bf   : > { %s3230_s18 = scalar_lea.hbm %s3966_s30, 4096  ;;  %s3234_s20 = scalar_lea.hbm %s4022_s3, 8192 }
 0x2c0   : > { %p3231_p10 = scmp.ne.s32.totalorder %s3966_s30, %s3230_s18  ;;  %p3235_p7 = scmp.lt.u32.totalorder %s3966_s30, %s4022_s3 }
 0x2c1   : > { %p3236_p3 = scmp.lt.u32.totalorder %s3234_s20, %s3230_s18  ;;  %p3238_p11 = scmp.lt.u32.totalorder %s3230_s18, %s3966_s30 }
 0x2c2   : > { %p3232_p4 = pnand %p3231_p10, %p3430_p13 }
 0x2c3   : > { %p3237_p2 = por %p3236_p3, %p3235_p7 }
 0x2c4   : > { %p3233_p1 = pneg %p3232_p4 }
 0x2c5   : > { %p3239_p6 = por %p3238_p11, %p3237_p2 }
 0x2c7   : > { %p3240_p8 = pnand %p3239_p6, %p3233_p1 }
 0x2c9   : > { %3243 = shalt.err (!%p3240_p8)
}
 0x2ca   : > { %s3307_s8 = smov 128   ;;  %s3308_s9 = smov 8  }
 0x2cb   : > { %3087 = dma.vmem_to_hbm [thread:$0]  (%p3430_p13), %s3968_s10, 4096, %s3966_s30, %s2239_s15, %s3307_s8, %s3307_s8, %s3308_s9  }
 0x2cc PF: > { %s2270_s29 = sand.u32 1, %s3282_s12   ;;  %p4074_p9 = scmp.ne.s32.totalorder %s4041_s23, 0 }
 0x2cd   : > { %p4075_p12 = scmp.ge.s32.totalorder %s3302_s17, 2  ;;  %s2271_s26 = scalar_lea.sflag [#allocation4], %s2270_s29 }
 0x2cf   : > { %p3098_p0 = pnand %p4075_p12, %p4074_p9 }
 0x2d1   : > { %3277 = dma.done.wait (!%p3098_p0), %s2271_s26, 4096  }
 0x2d2   : > { %3279 = vsyncadd (!%p3098_p0), %s2271_s26, 4294963200  ;;  %s20_s17 = sadd.s32 1, %s3302_s17   ;;  %s4076_s12 = smov %s3286_s13 }
 0x2d3   : > { %p17_p5 = scmp.ge.s32.totalorder %s20_s17, 4   ;;  %s4077_s13 = smov %s3290_s14 }
 0x2d4   : > { %s4078_s14 = smov %s3438_s5  ;;  %s4079_s15 = smov %s3298_s16 }
 0x2d5   : > { %s4080_s16 = smov %s4082_s28  ;;  %19 = sbr.rel (!%p17_p5) target bundleno = 7 (0x7), region = 85 }
 0x2dc   :  { %2276 = vsyncpa [#allocation3], 1 }
 0x2dd   :  { %2278 = vsyncpa [#allocation3 + $0x1], 1 }
 0x2de   :  { %2279 = vsyncpa [#allocation6], 1 }
 0x2df   :  { %2280 = vsyncpa [#allocation4], 1 }
 0x2e0   :  { %2282 = vsyncpa [#allocation4 + $0x1], 1 }

</bundles_post_ra>
